<compile_context>
chip_gen: v7x
topology: tpu7x:2x2x1
jax: 0.10.0
libtpu: 0.0.40
codegen_flags: <defaults>
</compile_context>

<pallas_src>
import jax
import jax.numpy as jnp
from jax import lax
from jax.experimental import pallas as pl
from jax.experimental.pallas import tpu as pltpu

block_size = 8   # max sequence length (tril buffer size in the PyTorch module)
n_embd = 32      # C
head_size = 16   # H


def _head_kernel(x_ref, w_ref, o_ref):
    # x_ref : (B, T, C)   VMEM
    # w_ref : (C, 3H)     VMEM (fused [Wk | Wq | Wv])
    # o_ref : (B, T, H)   VMEM
    B, T, C = x_ref.shape
    H = o_ref.shape[-1]

    x = x_ref[...].astype(jnp.float32)          # (B, T, C)
    w = w_ref[...].astype(jnp.float32)          # (C, 3H)

    # Single fused projection for all batch rows: (B*T, C) @ (C, 3H).
    x2 = x.reshape(B * T, C)
    kqv = jnp.dot(x2, w, preferred_element_type=jnp.float32)   # (B*T, 3H)
    k = kqv[:, 0 * H:1 * H].reshape(B, T, H)
    q = kqv[:, 1 * H:2 * H].reshape(B, T, H)
    v = kqv[:, 2 * H:3 * H].reshape(B, T, H)

    # Attention scores: batched contraction over the head dim, no explicit
    # transpose of k.  NOTE: scale is C ** -0.5 (n_embd), as in the PyTorch code.
    scale = C ** (-0.5)
    s = jnp.einsum('btd,bsd->bts', q, k,
                   preferred_element_type=jnp.float32)         # (B, T, T)

    # Causal (tril) mask fused with the scale into one select.
    row = lax.broadcasted_iota(jnp.int32, (T, T), 0)
    col = lax.broadcasted_iota(jnp.int32, (T, T), 1)
    causal = (col <= row)[None, :, :]                          # (1, T, T)
    s = jnp.where(causal, s * scale, -jnp.inf)

    # Softmax along the last axis.  The causal diagonal guarantees at least one
    # unmasked element per row, so exp/reciprocal are safe.
    m = jnp.max(s, axis=-1, keepdims=True)
    p = jnp.exp(s - m)
    denom = jnp.sum(p, axis=-1, keepdims=True)
    wei = p * pl.reciprocal(denom, approx=True)                # EUP, not VALU divide

    out = jnp.einsum('bts,bsd->btd', wei, v,
                     preferred_element_type=jnp.float32)       # (B, T, H)
    o_ref[...] = out.astype(o_ref.dtype)


def head_forward(x, w_key, w_query, w_value):
    """x: (B, T, C); w_*: (C, H)  ->  (B, T, H).

    Weights are stored as (C, H) so the projection is x @ W (equivalent to
    nn.Linear(C, H, bias=False) whose weight is (H, C) and computes x @ W.T).
    """
    B, T, C = x.shape
    H = w_key.shape[1]
    # Fuse the three projections into one (C, 3H) matrix on the wrapper side.
    w_kqv = jnp.concatenate([w_key, w_query, w_value], axis=1)

    return pl.pallas_call(
        _head_kernel,
        out_shape=jax.ShapeDtypeStruct((B, T, H), x.dtype),
        grid_spec=pltpu.PrefetchScalarGridSpec(
            num_scalar_prefetch=0,
            grid=(1,),                       # single step: whole problem fits VMEM
            in_specs=[
                pl.BlockSpec((B, T, C), lambda i: (0, 0, 0)),
                pl.BlockSpec((C, 3 * H), lambda i: (0, 0)),
            ],
            out_specs=pl.BlockSpec((B, T, H), lambda i: (0, 0, 0)),
        ),
        compiler_params=pltpu.CompilerParams(
            dimension_semantics=("arbitrary",)),
    )(x, w_kqv)


def head_reference(x, w_key, w_query, w_value):
    """Pure-JAX reference mirroring the PyTorch forward exactly."""
    B, T, C = x.shape
    k = x @ w_key
    q = x @ w_query
    v = x @ w_value
    wei = (q @ jnp.swapaxes(k, -2, -1)) * C ** (-0.5)
    tril = jnp.tril(jnp.ones((block_size, block_size)))[:T, :T]
    wei = jnp.where(tril == 0, -jnp.inf, wei)
    wei = jax.nn.softmax(wei, axis=-1)
    return wei @ v


if __name__ == "__main__":
    key = jax.random.PRNGKey(0)
    kx, kk, kq, kv = jax.random.split(key, 4)

    B, T, C, H = 2, block_size, n_embd, head_size
    x = jax.random.normal(kx, (B, T, C), dtype=jnp.float32)

    # Deterministic "linear layer" weights, stored as (C, H) for x @ W.
    w_key_p = jax.random.normal(kk, (C, H), dtype=jnp.float32) * (C ** -0.5)
    w_query_p = jax.random.normal(kq, (C, H), dtype=jnp.float32) * (C ** -0.5)
    w_value_p = jax.random.normal(kv, (C, H), dtype=jnp.float32) * (C ** -0.5)

    out = head_forward(x, w_key_p, w_query_p, w_value_p)
    out = jax.block_until_ready(out)

    ref = head_reference(x, w_key_p, w_query_p, w_value_p)
    assert out.shape == (B, T, H)
    # Tolerance loosened slightly (2e-3) to accommodate the EUP approximate
    # reciprocal in the softmax normalization.
    assert jnp.allclose(out, ref, atol=2e-3, rtol=2e-3), (
        f"max abs err {jnp.max(jnp.abs(out - ref))}")

    print("KERNEL_OK")
</pallas_src>

<mosaic_0001>
module attributes {stable_mosaic.version = 11 : i64} {
  func.func @_head_kernel(%arg0: i32, %arg1: memref<2x8x32xf32, #tpu.memory_space<vmem>>, %arg2: memref<32x48xf32, #tpu.memory_space<vmem>>, %arg3: memref<2x8x16xf32, #tpu.memory_space<vmem>>) attributes {dimension_semantics = [#tpu.dimension_semantics<arbitrary>], iteration_bounds = array<i64: 1>, scalar_prefetch = 0 : i64, scratch_operands = 0 : i64, tpu.core_type = #tpu.core_type<tc>, window_params = [{pipeline_mode = #tpu.pipeline_mode<synchronous>, transform_indices = @transform_0, window_bounds = array<i64: 2, 8, 32>}, {pipeline_mode = #tpu.pipeline_mode<synchronous>, transform_indices = @transform_1, window_bounds = array<i64: 32, 48>}, {pipeline_mode = #tpu.pipeline_mode<synchronous>, transform_indices = @transform_2, window_bounds = array<i64: 2, 8, 16>}]} {
    %c0 = arith.constant 0 : index
    %c0_0 = arith.constant 0 : index
    %c0_1 = arith.constant 0 : index
    %0 = vector.load %arg1[%c0, %c0_0, %c0_1] : memref<2x8x32xf32, #tpu.memory_space<vmem>>, vector<2x8x32xf32>
    %c0_2 = arith.constant 0 : index
    %c0_3 = arith.constant 0 : index
    %1 = vector.load %arg2[%c0_2, %c0_3] : memref<32x48xf32, #tpu.memory_space<vmem>>, vector<32x48xf32>
    %2 = vector.shape_cast %0 : vector<2x8x32xf32> to vector<16x32xf32>
    %cst = arith.constant dense<0.000000e+00> : vector<16x48xf32>
    %3 = tpu.matmul %2, %1, %cst {dimension_numbers = #tpu.dot_dimension_numbers<[1], [0], [0], [1], [0, 0, 1, 1], [], []>} : vector<16x32xf32>, vector<32x48xf32>, vector<16x48xf32> -> vector<16x48xf32>
    %4 = vector.extract_strided_slice %3 {offsets = [0, 0], sizes = [16, 16], strides = [1, 1]} : vector<16x48xf32> to vector<16x16xf32>
    %5 = vector.shape_cast %4 : vector<16x16xf32> to vector<2x8x16xf32>
    %6 = vector.extract_strided_slice %3 {offsets = [0, 16], sizes = [16, 16], strides = [1, 1]} : vector<16x48xf32> to vector<16x16xf32>
    %7 = vector.shape_cast %6 : vector<16x16xf32> to vector<2x8x16xf32>
    %8 = vector.extract_strided_slice %3 {offsets = [0, 32], sizes = [16, 16], strides = [1, 1]} : vector<16x48xf32> to vector<16x16xf32>
    %9 = vector.shape_cast %8 : vector<16x16xf32> to vector<2x8x16xf32>
    "tpu.trace_start"() <{level = 10 : i32, message = "btd,bsd->bts"}> : () -> ()
    %cst_4 = arith.constant dense<0.000000e+00> : vector<2x8x8xf32>
    %10 = tpu.matmul %7, %5, %cst_4 {dimension_numbers = #tpu.dot_dimension_numbers<[2], [2], [1], [1], [0, 0, 0, 1, 1, 1], [0], [0]>} : vector<2x8x16xf32>, vector<2x8x16xf32>, vector<2x8x8xf32> -> vector<2x8x8xf32>
    "tpu.trace_stop"() : () -> ()
    %11 = tpu.iota {dimensions = array<i32: 0>} : vector<8x8xi32>
    %12 = tpu.iota {dimensions = array<i32: 1>} : vector<8x8xi32>
    %13 = arith.cmpi sle, %12, %11 : vector<8x8xi32>
    %14 = vector.shape_cast %13 : vector<8x8xi1> to vector<1x8x8xi1>
    %cst_5 = arith.constant 0.176776692 : f32
    %15 = vector.broadcast %cst_5 : f32 to vector<2x8x8xf32>
    %16 = arith.mulf %10, %15 : vector<2x8x8xf32>
    %cst_6 = arith.constant 0xFF800000 : f32
    %17 = vector.shape_cast %14 : vector<1x8x8xi1> to vector<1x8x8xi1>
    %18 = vector.broadcast %17 : vector<1x8x8xi1> to vector<2x8x8xi1>
    %19 = vector.broadcast %cst_6 : f32 to vector<2x8x8xf32>
    %20 = arith.select %18, %16, %19 : vector<2x8x8xi1>, vector<2x8x8xf32>
    %cst_7 = arith.constant dense<0xFF800000> : vector<2x8xf32>
    %21 = vector.multi_reduction <maximumf>, %20, %cst_7 [2] : vector<2x8x8xf32> to vector<2x8xf32>
    %22 = vector.shape_cast %21 : vector<2x8xf32> to vector<2x8x1xf32>
    %23 = vector.broadcast %22 : vector<2x8x1xf32> to vector<2x8x8xf32>
    %24 = arith.subf %20, %23 : vector<2x8x8xf32>
    %25 = math.exp %24 : vector<2x8x8xf32>
    %cst_8 = arith.constant dense<0.000000e+00> : vector<2x8xf32>
    %26 = vector.multi_reduction <add>, %25, %cst_8 [2] : vector<2x8x8xf32> to vector<2x8xf32>
    %27 = vector.shape_cast %26 : vector<2x8xf32> to vector<2x8x1xf32>
    %28 = tpu.reciprocal %27 {approx = true} : vector<2x8x1xf32> -> vector<2x8x1xf32>
    %29 = vector.broadcast %28 : vector<2x8x1xf32> to vector<2x8x8xf32>
    %30 = arith.mulf %25, %29 : vector<2x8x8xf32>
    "tpu.trace_start"() <{level = 10 : i32, message = "bts,bsd->btd"}> : () -> ()
    %cst_9 = arith.constant dense<0.000000e+00> : vector<2x8x16xf32>
    %31 = tpu.matmul %30, %9, %cst_9 {dimension_numbers = #tpu.dot_dimension_numbers<[2], [1], [1], [2], [0, 0, 0, 1, 1, 2], [0], [0]>} : vector<2x8x8xf32>, vector<2x8x16xf32>, vector<2x8x16xf32> -> vector<2x8x16xf32>
    "tpu.trace_stop"() : () -> ()
    %c0_10 = arith.constant 0 : index
    %c0_11 = arith.constant 0 : index
    %c0_12 = arith.constant 0 : index
    %32 = vector.load %arg3[%c0_10, %c0_11, %c0_12] : memref<2x8x16xf32, #tpu.memory_space<vmem>>, vector<2x8x16xf32>
    tpu.vector_store %arg3[%c0_10, %c0_11, %c0_12], %31 {strides = array<i32>} : memref<2x8x16xf32, #tpu.memory_space<vmem>>, vector<2x8x16xf32>,
    return
  }
  func.func @transform_0(%arg0: i32) -> (i32, i32, i32) {
    %c0_i32 = arith.constant 0 : i32
    %c0_i32_0 = arith.constant 0 : i32
    %c0_i32_1 = arith.constant 0 : i32
    %c0_i32_2 = arith.constant 0 : i32
    return %c0_i32, %c0_i32_0, %c0_i32_1 : i32, i32, i32
  }
  func.func @transform_1(%arg0: i32) -> (i32, i32) {
    %c0_i32 = arith.constant 0 : i32
    %c0_i32_0 = arith.constant 0 : i32
    %c0_i32_1 = arith.constant 0 : i32
    return %c0_i32, %c0_i32_0 : i32, i32
  }
  func.func @transform_2(%arg0: i32) -> (i32, i32, i32) {
    %c0_i32 = arith.constant 0 : i32
    %c0_i32_0 = arith.constant 0 : i32
    %c0_i32_1 = arith.constant 0 : i32
    %c0_i32_2 = arith.constant 0 : i32
    return %c0_i32, %c0_i32_0, %c0_i32_1 : i32, i32, i32
  }
}

</mosaic_0001>

<bundles_post_ra>
// kernel: tpu_custom_call.1
= control target key start
LH: loop header
LB: loop body
LE: loop exit
PB: predicated region body
PF: predicated region fallthrough
CT: control target
= control target key end

     0   :  { %7 = vsyncpa [#allocation3], 0  ;;  %s724_s0 = inlined_call_operand.hbm [shape: f32[2,8,32], index: 0, kind: input, shape index: {}]   ;;  %s725_s1 = inlined_call_operand.hbm [shape: f32[32,48], index: 1, kind: input, shape index: {}]   ;;  %s726_s2 = inlined_call_operand.hbm [shape: f32[2,8,16], index: 2, kind: output, shape index: {}]  }
   0x1   :  { %8 = vsyncpa [#allocation6], 0 }
   0x2   :  { %9 = vsyncpa [#allocation4], 0  ;;  %s639_s9 = smov [#allocation2]   ;;  %s567_s13 = scalar_lea.hbm %s724_s0, 256 }
   0x3   :  { %s15_s10 = sshll.u32 %s639_s9, 4  ;;  %p568_p0 = scmp.ne.s32.totalorder %s724_s0, %s567_s13  ;;  %s16_s10 = int_to_ptr.vmem [resolvable:$true] %s15_s10 }
   0x4   :  { %p571_p1 = scmp.lt.u32.totalorder %s567_s13, %s724_s0 }
   0x6   :  { %p573_p2 = pnand %p571_p1, %p568_p0 }
   0x8   :  { %576 = shalt.err (!%p573_p2)
}
   0x9   :  { %s577_s18 = scalar_lea.vmem %s16_s10, 256  ;;  %p582_p4 = scmp.lt.s32.totalorder %s16_s10, %s16_s10 }
   0xa   :  { %p578_p3 = scmp.ne.s32.totalorder %s16_s10, %s577_s18  ;;  %p583_p5 = scmp.lt.s32.totalorder %s577_s18, %s577_s18 }
   0xc   :  { %p584_p6 = por %p583_p5, %p582_p4 }
   0xe   :  { %p585_p7 = pnand %p584_p6, %p578_p3 }
  0x10   :  { %588 = shalt.err (!%p585_p7)
}
  0x11   :  { %s640_s19 = smov 128   ;;  %s641_s20 = smov 8  }
  0x12   :  { %21 = dma.hbm_to_vmem [thread:$0]  %s724_s0, 256, %s16_s10, [#allocation3], %s640_s19, %s640_s19, %s641_s20  }
  0x13   :  { %s642_s23 = smov [#allocation5]   ;;  %s589_s27 = scalar_lea.hbm %s725_s1, 512 }
  0x14   :  { %s27_s24 = sshll.u32 %s642_s23, 4  ;;  %p590_p8 = scmp.ne.s32.totalorder %s725_s1, %s589_s27  ;;  %s28_s24 = int_to_ptr.vmem [resolvable:$true] %s27_s24 }
  0x15   :  { %p593_p9 = scmp.lt.u32.totalorder %s589_s27, %s725_s1 }
  0x17   :  { %p595_p10 = pnand %p593_p9, %p590_p8 }
  0x19   :  { %598 = shalt.err (!%p595_p10)
}
  0x1a   :  { %s599_s4 = scalar_lea.vmem %s28_s24, 512  ;;  %p604_p12 = scmp.lt.s32.totalorder %s28_s24, %s28_s24 }
  0x1b   :  { %p600_p11 = scmp.ne.s32.totalorder %s28_s24, %s599_s4  ;;  %p605_p13 = scmp.lt.s32.totalorder %s599_s4, %s599_s4 }
  0x1d   :  { %p606_p0 = por %p605_p13, %p604_p12 }
  0x1f   :  { %p607_p1 = pnand %p606_p0, %p600_p11 }
  0x21   :  { %610 = shalt.err (!%p607_p1)
}
  0x22   :  { %33 = dma.hbm_to_vmem [thread:$0]  %s725_s1, 512, %s28_s24, [#allocation6], %s640_s19, %s640_s19, %s641_s20  }
  0x23   :  { %633 = dma.done.wait [#allocation3], 256  }
  0x24   :  { %634 = vsyncadd [#allocation3], 4294967040 }
  0x25   :  { %635 = dma.done.wait [#allocation6], 512  }
  0x26   :  { %636 = vsyncadd [#allocation6], 4294966784  ;;  %vm46_vm0 = vcmask 261120   ;;  %v42_v0 = vld [vmem:[#allocation5] sm:$0xff]  ;;  %v43_v1 = vld [vmem:[#allocation5 + $0x8] sm:$0xff]  ;;  %v643_v8 = vmov 0.0   ;;  %v283_v13 = vlaneseq }
  0x27   :  { %v44_v2 = vld [vmem:[#allocation5 + $0x10] sm:$0xff]  ;;  %v542_v3 = vpack.c.bf16 %v43_v1, %v42_v0  ;;  %v45_v4 = vld [vmem:[#allocation5 + $0x18] sm:$0xff]  ;;  %522 = vmatprep.subr.mxu1 %v643_v8  ;;  %vm644_vm1 = vmmov 0   ;;  %vm131_vm2 = vcmask 130048   ;;  %s645_s1 = smov 112   ;;  %vm294_vm4 = vcmask 64512  }
  0x28   :  { %v40_v5 = vld [vmem:[#allocation2] sm:$0xff]  ;;  %v546_v6 = vpack.c.bf16 %v45_v4, %v44_v2  ;;  %v41_v7 = vld [vmem:[#allocation2 + $0x8] sm:$0xff]  ;;  %524 = vmatprep.mubr.msk.f32.mxu1 %vm644_vm1, %v643_v8  ;;  %v284_v14 = vshrl.u32 %v283_v13, 7  ;;  %v286_v15 = vand.u32 127, %v283_v13  ;;  %s646_s6 = smov 96   ;;  %s647_s7 = smov [#allocation7]  }
  0x29   :  { %519 = vmatprep.mubr.msk.f32.mxu0 %vm46_vm0, %v40_v5  ;;  %543 = vmatprep.subr.bf16.mxu0 %v542_v3  ;;  %s476_s8 = sshll.u32 %s647_s7, 4  ;;  %s477_s8 = int_to_ptr.vmem [resolvable:$true] %s476_s8 }
  0x2a   :  { %545 = vmatpush3.bf16.msra.mxu0 %v542_v3  ;;  %vm287_vm3 = vcmp.le.s32.totalorder %v286_v15, %v284_v14  ;;  %s611_s9 = scalar_lea.vmem %s477_s8, 256  ;;  %p616_p3 = scmp.lt.s32.totalorder %s477_s8, %s477_s8 }
  0x2b   :  { %547 = vmatprep.subr.bf16.mxu0 %v546_v6  ;;  %p612_p2 = scmp.ne.s32.totalorder %s477_s8, %s611_s9  ;;  %p617_p4 = scmp.lt.s32.totalorder %s611_s9, %s611_s9 }
  0x2d   :  { %p618_p5 = por %p617_p4, %p616_p3 }
  0x2e   :  { %549 = vmatpush3.bf16.msra.mxu0 %v546_v6 }
  0x2f   :  { %532 = vmatprep.subr.mxu0 %v643_v8  ;;  %p619_p6 = pnand %p618_p5, %p612_p2 }
  0x31   :  { %520 = vmatmul.mubr.msk.f32.vlgmr.msra.gmra.mrb[0].mxu0 %vm46_vm0, %v41_v7 }
  0x32   :  { %534 = vmatprep.mubr.msk.f32.mxu0 %vm644_vm1, %v643_v8 }
 0x104   :  { %v521_v9 = vpop.f32.mrb[0].mxu0 }
 0x105   :  { %v119_v10 = vpop.f32.mrb[1].mxu0 }
 0x106   :  { %129 = vrot.lane.b32.xlu0 %v119_v10, %s645_s1  ;;  %523 = vmatpush3.xpose.msk.msra.mxu1 %vm131_vm2, %v119_v10 }
 0x107   :  { %527 = vmatprep.subr.mxu1 %v643_v8 }
 0x10a   :  { %207 = vrot.lane.b32.xlu0 %v521_v9, %s645_s1 }
 0x178   :  { %v130_v11 = vpop.permute.xlu0 %129 }
 0x179   :  { %525 = vmatmul.mubr.msk.f32.vlgmr.msra.gmra.mrb[0].mxu1 %vm131_vm2, %v130_v11 }
 0x17a   :  { %528 = vmatpush3.xpose.msk.msra.mxu1 %vm131_vm2, %v521_v9  ;;  %529 = vmatprep.mubr.msk.f32.mxu1 %vm644_vm1, %v643_v8 }
 0x17b   :  { %537 = vmatprep.subr.mxu1 %v643_v8 }
 0x17c   :  { %v208_v12 = vpop.permute.xlu0 %207 }
 0x17d   :  { %530 = vmatmul.mubr.msk.f32.vlgmr.msra.gmra.mrb[2].mxu1 %vm131_vm2, %v208_v12 }
 0x17e   :  { %539 = vmatprep.mubr.msk.f32.mxu1 %vm644_vm1, %v643_v8 }
 0x24c   :  { %v202_v16 = vpop.f32.mrb[0].mxu1 }
 0x24d   :  { %v288_v17 = vmul.f32 0.17677669, %v202_v16  ;;  %v526_v18 = vpop.f32.mrb[1].mxu1 }
 0x24f   :  { %v292_v19 = vsel %vm287_vm3, %v288_v17, -inf }
 0x250   :  { %v279_v20 = vpop.f32.mrb[2].mxu1  ;;  %v295_v21 = vsel %vm294_vm4, %v292_v19, -inf }
 0x251   :  { %v289_v22 = vmul.f32 0.17677669, %v279_v20  ;;  %296 = vmax.xlane.f32.xlu1 %v295_v21  ;;  %v531_v23 = vpop.f32.mrb[3].mxu1 }
 0x253   :  { %v293_v24 = vsel %vm287_vm3, %v289_v22, -inf }
 0x254   :  { %v298_v25 = vsel %vm294_vm4, %v293_v24, -inf }
 0x255   :  { %299 = vmax.xlane.f32.xlu1 %v298_v25 }
 0x266   :  { %317 = vrot.lane.b32.xlu1 %v119_v10, %s646_s6 }
 0x2de   :  { %v297_v26 = vpop.xlane.xlu1 %296 }
 0x2df   :  { %v301_v27 = vsub.f32 %v292_v19, %v297_v26 }
 0x2e1   :  { %v303_v28 = vmul.f32 1.442695, %v301_v27 }
 0x2e2   :  { %v300_v29 = vpop.xlane.xlu1 %299 }
 0x2e3   :  { %559 = vpow2.f32 %v303_v28  ;;  %v302_v30 = vsub.f32 %v293_v24, %v300_v29 }
 0x2e5   :  { %v305_v31 = vmul.f32 1.442695, %v302_v30 }
 0x2e6   :  { %v318_v32 = vpop.permute.xlu1 %317 }
 0x2e7   :  { %561 = vpow2.f32 %v305_v31  ;;  %533 = vmatpush3.msra.mxu0 %v318_v32 }
 0x2ed   :  { %v560_v33 = vpop.eup %559 }
 0x2ee   :  { %v307_v34 = vsel %vm294_vm4, %v560_v33, 0.0 }
 0x2ef   :  { %308 = vadd.xlane.f32.xlu0 %v307_v34 }
 0x2f1   :  { %v562_v35 = vpop.eup %561 }
 0x2f2   :  { %v310_v36 = vsel %vm294_vm4, %v562_v35, 0.0 }
 0x2f3   :  { %311 = vadd.xlane.f32.xlu1 %v310_v36 }
 0x304   :  { %393 = vrot.lane.b32.xlu1 %v521_v9, %s646_s6 }
 0x37c   :  { %v309_v37 = vpop.xlane.xlu0 %308 }
 0x37d   :  { %563 = vrcp.f32 %v309_v37 }
 0x380   :  { %v312_v38 = vpop.xlane.xlu1 %311 }
 0x381   :  { %565 = vrcp.f32 %v312_v38 }
 0x384   :  { %v394_v39 = vpop.permute.xlu1 %393 }
 0x385   :  { %538 = vmatpush3.msra.mxu1 %v394_v39 }
 0x387   :  { %v564_v40 = vpop.eup %563 }
 0x388   :  { %v315_v41 = vmul.f32 %v564_v40, %v560_v33 }
 0x38a   :  { %535 = vmatmul.mubr.msk.f32.vlgmr.msra.gmra.mrb[2].mxu0 %vm294_vm4, %v315_v41 }
 0x38b   :  { %v566_v42 = vpop.eup %565 }
 0x38c   :  { %v316_v43 = vmul.f32 %v566_v42, %v562_v35 }
 0x38e   :  { %540 = vmatmul.mubr.msk.f32.vlgmr.msra.gmra.mrb[4].mxu1 %vm294_vm4, %v316_v43 }
 0x45d   :  { %v389_v44 = vpop.f32.mrb[2].mxu0 }
 0x45e   :  { %469 = vst.msk [vmem:[#allocation7] sm:$0xff] %vm131_vm2, %v389_v44  ;;  %v536_v45 = vpop.f32.mrb[3].mxu0 }
 0x461   :  { %v465_v46 = vpop.f32.mrb[4].mxu1 }
 0x462   :  { %470 = vst.msk [vmem:[#allocation7 + $0x8] sm:$0xff] %vm131_vm2, %v465_v46  ;;  %v541_v47 = vpop.f32.mrb[5].mxu1 }
 0x463   :  { %622 = shalt.err (!%p619_p6)
}
 0x464   :  { %s623_s12 = scalar_lea.hbm %s726_s2, 256 }
 0x465   :  { %p624_p7 = scmp.ne.s32.totalorder %s726_s2, %s623_s12  ;;  %p627_p8 = scmp.lt.u32.totalorder %s623_s12, %s726_s2 }
 0x467   :  { %p629_p9 = pnand %p627_p8, %p624_p7 }
 0x469   :  { %632 = shalt.err (!%p629_p9)
}
 0x46a   :  { %482 = dma.vmem_to_hbm [thread:$0]  %s477_s8, 256, %s726_s2, [#allocation4], %s640_s19, %s640_s19, %s641_s20  }
 0x46b   :  { %637 = dma.done.wait [#allocation4], 256  }
 0x46c   :  { %638 = vsyncadd [#allocation4], 4294967040 }
 0x46d   :  { %486 = vsyncpa [#allocation3], 1 }
 0x46e   :  { %487 = vsyncpa [#allocation6], 1 }
 0x46f   :  { %488 = vsyncpa [#allocation4], 1 }

</bundles_post_ra>
